<compile_context>
chip_gen: v6e
topology: v6e:2x2x1
jax: 0.10.0
libtpu: 0.0.40
codegen_flags: <defaults>
</compile_context>

<pallas_src>
import jax
import jax.numpy as jnp
from jax import lax
from jax.experimental import pallas as pl
from jax.experimental.pallas import tpu as pltpu


def _make_group_norm_kernel(num_groups, cpg_lanes, denom, eps):
    """Kernel over one batch element: x block (1, nt, F) -> normalized block."""

    def kernel(x_ref, gamma_ref, beta_ref, o_ref):
        x = x_ref[0].astype(jnp.float32)                 # (nt, F)
        gamma = gamma_ref[...].astype(jnp.float32)       # (1, F)
        beta = beta_ref[...].astype(jnp.float32)         # (1, F)

        # Column partial sums (reduce over sublane/time axis), full lane width.
        col_sum = jnp.sum(x, axis=0, keepdims=True)      # (1, F)
        col_sq = jnp.sum(x * x, axis=0, keepdims=True)   # (1, F)

        if num_groups == 1:
            mean = jnp.sum(col_sum) / denom
            var = jnp.maximum(jnp.sum(col_sq) / denom - mean * mean, 0.0)
            inv = lax.rsqrt(var + eps)
            mean_l = mean                                # scalars broadcast
            inv_l = inv
        else:
            f_total = x.shape[-1]
            lane = lax.broadcasted_iota(jnp.int32, (1, f_total), 1)
            gid = lane // cpg_lanes                      # group id per lane
            mean_l = jnp.zeros((1, f_total), jnp.float32)
            inv_l = jnp.zeros((1, f_total), jnp.float32)
            for g in range(num_groups):                  # static, unrolled
                m = gid == g
                s = jnp.sum(jnp.where(m, col_sum, 0.0))
                sq = jnp.sum(jnp.where(m, col_sq, 0.0))
                mean = s / denom
                var = jnp.maximum(sq / denom - mean * mean, 0.0)
                inv = lax.rsqrt(var + eps)
                mean_l = jnp.where(m, mean, mean_l)
                inv_l = jnp.where(m, inv, inv_l)

        # Fused normalize + per-feature affine; single full-width store.
        y = (x - mean_l) * (inv_l * gamma) + beta
        o_ref[0] = y.astype(o_ref.dtype)

    return kernel


def group_norm(x, gamma, beta, num_groups=1, eps=1e-5):
    """Pallas equivalent of the nussl GroupNorm module forward.

    x: (nb, nt, nf, nc); gamma, beta: (nf,). Returns (nb, nt, nf, nc).
    """
    nb, nt, nf, nc = x.shape
    assert nf % num_groups == 0, "num_features must be divisible by num_groups"
    assert gamma.shape == (nf,) and beta.shape == (nf,)

    F = nf * nc
    itemsize = jnp.dtype(x.dtype).itemsize

    # Free contiguous reshape; lane index = f*nc + c.
    x2 = x.reshape(nb, nt, F)
    gamma2 = jnp.repeat(gamma, nc).reshape(1, F)
    beta2 = jnp.repeat(beta, nc).reshape(1, F)

    cpg_lanes = (nf // num_groups) * nc            # lanes per group
    denom = float(cpg_lanes * nt)                  # elements per (batch, group)

    kernel = _make_group_norm_kernel(num_groups, cpg_lanes, denom, eps)

    # VMEM budget: 2 pipeline buffers each for the in/out block + params + slack.
    block_bytes = nt * F * itemsize
    vmem_needed = 4 * block_bytes + 4 * F * 4 + (2 << 20)
    vmem_limit = int(min(max(vmem_needed, 8 << 20), 64 << 20))

    n_elem = nb * nt * F
    cost = pl.CostEstimate(
        flops=9 * n_elem,
        transcendentals=nb * num_groups,
        bytes_accessed=2 * n_elem * itemsize + 2 * F * 4,
    )

    out2 = pl.pallas_call(
        kernel,
        out_shape=jax.ShapeDtypeStruct((nb, nt, F), x.dtype),
        grid_spec=pltpu.PrefetchScalarGridSpec(
            num_scalar_prefetch=0,
            grid=(nb,),
            in_specs=[
                pl.BlockSpec((1, nt, F), lambda b: (b, 0, 0)),
                pl.BlockSpec((1, F), lambda b: (0, 0)),
                pl.BlockSpec((1, F), lambda b: (0, 0)),
            ],
            out_specs=pl.BlockSpec((1, nt, F), lambda b: (b, 0, 0)),
        ),
        compiler_params=pltpu.CompilerParams(
            dimension_semantics=("parallel",),
            vmem_limit_bytes=vmem_limit,
        ),
        cost_estimate=cost,
    )(x2, gamma2, beta2)

    return out2.reshape(nb, nt, nf, nc)


def group_norm_ref(x, gamma, beta, num_groups=1, eps=1e-5):
    """Pure-JAX reference mirroring the PyTorch module's forward."""
    nb, nt, nf, nc = x.shape
    xt = jnp.transpose(x, (0, 2, 1, 3))                      # (nb, nf, nt, nc)
    xg = xt.reshape(nb, num_groups, -1)
    mean = xg.mean(axis=-1, keepdims=True)
    var = xg.var(axis=-1, keepdims=True)
    xn = (xg - mean) / jnp.sqrt(var + eps)
    xn = xn.reshape(nb, nf, nt, nc)
    xn = xn * gamma[None, :, None, None] + beta[None, :, None, None]
    return jnp.transpose(xn, (0, 2, 1, 3))                   # (nb, nt, nf, nc)


if __name__ == "__main__":
    key = jax.random.PRNGKey(0)
    kx, kg, kb = jax.random.split(key, 3)

    # Small shapes consistent with the module: (nb, nt, nf, nc).
    nb, nt, nf, nc = 2, 16, 64, 2
    x = jax.random.normal(kx, (nb, nt, nf, nc), dtype=jnp.float32)
    # nn.GroupNorm default affine=True (gamma=1, beta=0); use non-trivial
    # values to actually exercise the affine path.
    gamma = 1.0 + 0.1 * jax.random.normal(kg, (nf,), dtype=jnp.float32)
    beta = 0.1 * jax.random.normal(kb, (nf,), dtype=jnp.float32)

    for G in (1, 4):  # default num_groups=1, plus a multi-group check
        out = group_norm(x, gamma, beta, num_groups=G)
        out = jax.block_until_ready(out)
        ref = group_norm_ref(x, gamma, beta, num_groups=G)
        assert out.shape == ref.shape and out.dtype == ref.dtype
        assert bool(jnp.allclose(out, ref, atol=1e-4, rtol=1e-4)), (
            f"mismatch vs reference for num_groups={G}"
        )

    print("KERNEL_OK")
</pallas_src>

<mosaic_0001>
module attributes {stable_mosaic.version = 11 : i64} {
  func.func @kernel(%arg0: i32, %arg1: memref<1x16x128xf32, #tpu.memory_space<vmem>>, %arg2: memref<1x128xf32, #tpu.memory_space<vmem>>, %arg3: memref<1x128xf32, #tpu.memory_space<vmem>>, %arg4: memref<1x16x128xf32, #tpu.memory_space<vmem>>) attributes {dimension_semantics = [#tpu.dimension_semantics<parallel>], iteration_bounds = array<i64: 2>, scalar_prefetch = 0 : i64, scratch_operands = 0 : i64, tpu.core_type = #tpu.core_type<tc>, window_params = [{transform_indices = @transform_0, window_bounds = array<i64: 1, 16, 128>}, {pipeline_mode = #tpu.pipeline_mode<synchronous>, transform_indices = @transform_1, window_bounds = array<i64: 1, 128>}, {pipeline_mode = #tpu.pipeline_mode<synchronous>, transform_indices = @transform_2, window_bounds = array<i64: 1, 128>}, {transform_indices = @transform_3, window_bounds = array<i64: 1, 16, 128>}]} {
    %c0 = arith.constant 0 : index
    %c0_0 = arith.constant 0 : index
    %c0_1 = arith.constant 0 : index
    %0 = vector.load %arg1[%c0, %c0_0, %c0_1] : memref<1x16x128xf32, #tpu.memory_space<vmem>>, vector<1x16x128xf32>
    %1 = vector.shape_cast %0 : vector<1x16x128xf32> to vector<16x128xf32>
    %c0_2 = arith.constant 0 : index
    %c0_3 = arith.constant 0 : index
    %2 = vector.load %arg2[%c0_2, %c0_3] : memref<1x128xf32, #tpu.memory_space<vmem>>, vector<1x128xf32>
    %c0_4 = arith.constant 0 : index
    %c0_5 = arith.constant 0 : index
    %3 = vector.load %arg3[%c0_4, %c0_5] : memref<1x128xf32, #tpu.memory_space<vmem>>, vector<1x128xf32>
    %cst = arith.constant dense<0.000000e+00> : vector<128xf32>
    %4 = vector.multi_reduction <add>, %1, %cst [0] : vector<16x128xf32> to vector<128xf32>
    %5 = vector.shape_cast %4 : vector<128xf32> to vector<1x128xf32>
    %6 = arith.mulf %1, %1 : vector<16x128xf32>
    %cst_6 = arith.constant dense<0.000000e+00> : vector<128xf32>
    %7 = vector.multi_reduction <add>, %6, %cst_6 [0] : vector<16x128xf32> to vector<128xf32>
    %8 = vector.shape_cast %7 : vector<128xf32> to vector<1x128xf32>
    %9 = vector.shape_cast %5 : vector<1x128xf32> to vector<1x1x128xf32>
    %cst_7 = arith.constant dense<0.000000e+00> : vector<1xf32>
    %10 = vector.multi_reduction <add>, %9, %cst_7 [1, 2] : vector<1x1x128xf32> to vector<1xf32>
    %11 = vector.shape_cast %10 : vector<1xf32> to vector<1x1x1xf32>
    %12 = vector.extract %11[0, 0, 0] : f32 from vector<1x1x1xf32>
    %cst_8 = arith.constant 2.048000e+03 : f32
    %13 = arith.divf %12, %cst_8 : f32
    %14 = vector.shape_cast %8 : vector<1x128xf32> to vector<1x1x128xf32>
    %cst_9 = arith.constant dense<0.000000e+00> : vector<1xf32>
    %15 = vector.multi_reduction <add>, %14, %cst_9 [1, 2] : vector<1x1x128xf32> to vector<1xf32>
    %16 = vector.shape_cast %15 : vector<1xf32> to vector<1x1x1xf32>
    %17 = vector.extract %16[0, 0, 0] : f32 from vector<1x1x1xf32>
    %cst_10 = arith.constant 2.048000e+03 : f32
    %18 = arith.divf %17, %cst_10 : f32
    %19 = arith.mulf %13, %13 : f32
    %20 = arith.subf %18, %19 : f32
    %cst_11 = arith.constant 0.000000e+00 : f32
    %21 = arith.maximumf %20, %cst_11 : f32
    %cst_12 = arith.constant 9.99999974E-6 : f32
    %22 = arith.addf %21, %cst_12 : f32
    %23 = math.rsqrt %22 : f32
    %24 = vector.broadcast %13 : f32 to vector<16x128xf32>
    %25 = arith.subf %1, %24 : vector<16x128xf32>
    %26 = vector.broadcast %23 : f32 to vector<1x128xf32>
    %27 = arith.mulf %26, %2 : vector<1x128xf32>
    %28 = vector.broadcast %27 : vector<1x128xf32> to vector<16x128xf32>
    %29 = arith.mulf %25, %28 : vector<16x128xf32>
    %30 = vector.broadcast %3 : vector<1x128xf32> to vector<16x128xf32>
    %31 = arith.addf %29, %30 : vector<16x128xf32>
    %c0_13 = arith.constant 0 : index
    %c0_14 = arith.constant 0 : index
    %c0_15 = arith.constant 0 : index
    %32 = vector.load %arg4[%c0_13, %c0_14, %c0_15] : memref<1x16x128xf32, #tpu.memory_space<vmem>>, vector<1x16x128xf32>
    %33 = vector.shape_cast %32 : vector<1x16x128xf32> to vector<16x128xf32>
    %34 = vector.shape_cast %31 : vector<16x128xf32> to vector<1x16x128xf32>
    tpu.vector_store %arg4[%c0_13, %c0_14, %c0_15], %34 {strides = array<i32>} : memref<1x16x128xf32, #tpu.memory_space<vmem>>, vector<1x16x128xf32>,
    return
  }
  func.func @transform_0(%arg0: i32) -> (i32, i32, i32) {
    %c0_i32 = arith.constant 0 : i32
    %c0_i32_0 = arith.constant 0 : i32
    %c0_i32_1 = arith.constant 0 : i32
    return %arg0, %c0_i32, %c0_i32_0 : i32, i32, i32
  }
  func.func @transform_1(%arg0: i32) -> (i32, i32) {
    %c0_i32 = arith.constant 0 : i32
    %c0_i32_0 = arith.constant 0 : i32
    %c0_i32_1 = arith.constant 0 : i32
    return %c0_i32, %c0_i32_0 : i32, i32
  }
  func.func @transform_2(%arg0: i32) -> (i32, i32) {
    %c0_i32 = arith.constant 0 : i32
    %c0_i32_0 = arith.constant 0 : i32
    %c0_i32_1 = arith.constant 0 : i32
    return %c0_i32, %c0_i32_0 : i32, i32
  }
  func.func @transform_3(%arg0: i32) -> (i32, i32, i32) {
    %c0_i32 = arith.constant 0 : i32
    %c0_i32_0 = arith.constant 0 : i32
    %c0_i32_1 = arith.constant 0 : i32
    return %arg0, %c0_i32, %c0_i32_0 : i32, i32, i32
  }
}

</mosaic_0001>

<bundles_post_ra>
// kernel: tpu_custom_call.1
= control target key start
LH: loop header
LB: loop body
LE: loop exit
PB: predicated region body
PF: predicated region fallthrough
CT: control target
= control target key end

     0   :  { %8 = vsyncpa [#allocation3], 0  ;;  %s714_s0 = inlined_call_operand.hbm [shape: f32[2,16,128], index: 0, kind: input, shape index: {}]   ;;  %s715_s1 = inlined_call_operand.vmem [shape: f32[1,128], index: 1, kind: input, shape index: {}]   ;;  %s716_s2 = inlined_call_operand.vmem [shape: f32[1,128], index: 2, kind: input, shape index: {}]   ;;  %s717_s3 = inlined_call_operand.hbm [shape: f32[2,16,128], index: 3, kind: output, shape index: {}]  }
   0x1   :  { %10 = vsyncpa [#allocation3 + $0x1], 0 }
   0x2   :  { %11 = vsyncpa [#allocation4], 0 }
   0x3   :  { %13 = vsyncpa [#allocation4 + $0x1], 0  ;;  %s550_s12 = smov 0   ;;  %s552_s13 = smov 0  }
   0x4   :  { %s554_s14 = smov 0   ;;  %s556_s15 = smov 0  }
   0x5 LB: > { %s571_s16 = sadd.s32 4294967295, %s521_s15   ;;  %s353_s17 = sadd.s32 4294967294, %s521_s15   ;;  %s521_s15 = sphi %s556_s15, %s732_s15   ;;  %s517_s14 = sphi %s554_s14, %s731_s14   ;;  %s513_s13 = sphi %s552_s13, %s730_s13   ;;  %s509_s12 = sphi %s550_s12, %s729_s12  }
   0x6   : > { %s575_s18 = sadd.s32 1, %s521_s15   ;;  %s26_s19 = sadd.s32 1, %s517_s14 }
   0x7   : > { %s23_s20 = ssub.s32 %s521_s15, %s575_s18  ;;  %p33_p0 = scmp.ne.s32.totalorder %s517_s14, %s513_s13 }
   0x8   : > { %p24_p1 = scmp.eq.s32.totalorder %s23_s20, 0  ;;  %p34_p2 = scmp.eq.s32.totalorder %s521_s15, 0 }
   0x9   : > { %p39_p3 = scmp.ne.s32.totalorder %s513_s13, %s509_s12  ;;  %p40_p4 = scmp.eq.s32.totalorder %s571_s16, 0 }
   0xa   : > { %s587_s21 = scalar_select %p24_p1, %s517_s14, %s26_s19  }
   0xb   : > { %p589_p5 = por %p34_p2, %p33_p0  ;;  %p593_p6 = por %p40_p4, %p39_p3 }
   0xc   : > { %p105_p7 = scmp.eq.s32.totalorder %s571_s16, 1  ;;  %p111_p8 = scmp.eq.s32.totalorder %s353_s17, 1 }
   0xd   : > { %s721_s23 = scalar_select %p593_p6, 1, 0 }
   0xe   : > { %p388_p10 = scmp.lt.s32.totalorder %s521_s15, 2  ;;  %p600_p11 = por %p105_p7, %p33_p0 }
   0xf   : > { %p604_p12 = por %p111_p8, %p39_p3  ;;  %s137_s26 = sand.u32 1, %s517_s14  }
  0x10   : > { %s722_s24 = scalar_select %p600_p11, 1, 0 }
  0x11   : > { %s723_s25 = scalar_select %p604_p12, 1, 0 }
  0x12   : > { %s368_s27 = sshll.u32 %s521_s15, 8  ;;  %s356_s28 = sshll.u32 %s137_s26, 4 }
  0x13   : > { %s613_s4 = scalar_lea.hbm %s714_s0, %s368_s27  ;;  %s141_s5 = scalar_lea.vmem [#allocation2], %s356_s28 }
  0x14   : > { %s148_s6 = sshll.u32 %s141_s5, 4  ;;  %p617_p13 = pnand %p388_p10, %p589_p5  ;;  %s621_s6 = int_to_ptr.vmem [resolvable:$true] %s148_s6 }
  0x15   : > { %s623_s8 = scalar_lea.sflag [#allocation3], %s137_s26  ;;  %s429_s9 = scalar_lea.hbm %s613_s4, 256 }
  0x16   : > { %p430_p0 = scmp.ne.s32.totalorder %s613_s4, %s429_s9  ;;  %p431_p1 = pneg %p617_p13 }
  0x17   : > { %s434_s17 = scalar_lea.hbm %s714_s0, 512  ;;  %p435_p4 = scmp.lt.s32.totalorder %s613_s4, %s714_s0 }
  0x18   : > { %p432_p2 = pnand %p431_p1, %p430_p0  ;;  %p436_p5 = scmp.lt.s32.totalorder %s434_s17, %s429_s9 }
  0x1a   : > { %p433_p3 = pneg %p432_p2  ;;  %p437_p7 = por %p436_p5, %p435_p4 }
  0x1c   : > { %p438_p8 = pnand %p437_p7, %p433_p3 }
  0x1e   : > { %441 = shalt.err (!%p438_p8)
}
  0x1f   : > { %s442_s22 = scalar_lea.vmem %s621_s6, 256  ;;  %s523_s26 = smov [#allocation2]  }
  0x20   : > { %p443_p10 = scmp.ne.s32.totalorder %s621_s6, %s442_s22  ;;  %s447_s27 = sshll.u32 %s523_s26, 4  ;;  %s448_s27 = int_to_ptr.vmem [resolvable:$false] %s447_s27 }
  0x21   : > { %s449_s28 = scalar_lea.vmem %s448_s27, 512  ;;  %p450_p2 = scmp.lt.s32.totalorder %s621_s6, %s448_s27 }
  0x22   : > { %p445_p9 = pnand %p443_p10, %p431_p1  ;;  %p451_p12 = scmp.lt.s32.totalorder %s449_s28, %s442_s22 }
  0x24   : > { %p446_p0 = pneg %p445_p9  ;;  %p452_p11 = por %p451_p12, %p450_p2 }
  0x26   : > { %p453_p6 = pnand %p452_p11, %p446_p0 }
  0x28   : > { %456 = shalt.err (!%p453_p6)
}
  0x29   : > { %s524_s29 = smov 128   ;;  %s525_s30 = smov 8  }
  0x2a   : > { %383 = dma.hbm_to_vmem [thread:$0]  (!%p617_p13), %s613_s4, 256, %s621_s6, %s623_s8, %s524_s29, %s524_s29, %s525_s30  }
  0x2b   : > { %p359_p9 = scmp.ge.s32.totalorder %s521_s15, 1  ;;  %p156_p1 = scmp.lt.s32.totalorder %s521_s15, 3 }
  0x2d   : > { %p157_p3 = pnand %p359_p9, %p156_p1 }
  0x2e   : > { %s647_s5 = sand.u32 (!%p157_p3), 1, %s513_s13   ;;  %p725_p6 = scmp.ne.s32.totalorder (!%p157_p3), %s721_s23, 0 }
  0x2f   : > { %160 = sbr.rel (%p157_p3) target bundleno = 368 (0x170), region = 32  ;;  %s360_s9 = sshll.u32 (!%p157_p3), %s647_s5, 4 }
  0x30   : > { %s163_s10 = scalar_lea.sflag (!%p157_p3), [#allocation3], %s647_s5  ;;  %s166_s11 = scalar_lea.vmem (!%p157_p3), [#allocation2], %s360_s9 }
  0x34   : > { %500 = dma.done.wait (%p725_p6), %s163_s10, 256  }
  0x35   : > { %502 = vsyncadd (%p725_p6), %s163_s10, 4294967040  ;;  %v189_v0 = vld [vmem:[%s166_s11] sm:$0xff]  ;;  %v190_v1 = vld [vmem:[%s166_s11 + $0x8] sm:$0xff]  ;;  %vm209_vm0 = vcmask 1040384   ;;  %s526_s19 = smov 0.0   ;;  %v249_v36 = vlaneseq  ;;  %s369_s29 = sshll.u32 %s571_s16, 8 }
  0x36   : > { %v193_v2 = vadd.f32 %v190_v1, %v189_v0  ;;  %v200_v3 = vmul.f32 %v189_v0, %v189_v0  ;;  %v201_v4 = vmul.f32 %v190_v1, %v190_v1  ;;  %v191_v38 = vld [vmem:[%s715_s1] sm:$0x1]  ;;  %s188_s30 = scalar_lea.vmem [#allocation5], %s360_s9  ;;  %s267_s16 = scalar_lea.sflag [#allocation4], %s647_s5 }
  0x37   : > { %v250_v37 = vshrl.u32 %v249_v36, 7  ;;  %s280_s10 = sshll.u32 %s188_s30, 4  ;;  %v362_v46 = vld [vmem:[%s716_s2] ss:$0 sm:$0xff]  ;;  %p726_p12 = scmp.ne.s32.totalorder %s722_s24, 0  ;;  %s671_s10 = int_to_ptr.vmem [resolvable:$true] %s280_s10 }
  0x38   : > { %v194_v5 = vrot.slane %v193_v2, 4  ;;  %v202_v6 = vadd.f32 %v201_v4, %v200_v3  ;;  %s457_s9 = scalar_lea.vmem %s671_s10, 256 }
  0x39   : > { %v251_v39 = vsub.s32 0, %v250_v37  ;;  %p458_p11 = scmp.ne.s32.totalorder %s671_s10, %s457_s9 }
  0x3a   : > { %v195_v7 = vadd.f32 %v194_v5, %v193_v2  ;;  %v203_v8 = vrot.slane %v202_v6, 4 }
  0x3b   : > { %p459_p13 = pnand %p458_p11, %p726_p12 }
  0x3c   : > { %v196_v9 = vrot.slane %v195_v7, 2  ;;  %v204_v10 = vadd.f32 %v203_v8, %v202_v6 }
  0x3d   : > { %p460_p4 = pneg %p459_p13 }
  0x3e   : > { %v197_v11 = vadd.f32 %v196_v9, %v195_v7  ;;  %v205_v12 = vrot.slane %v204_v10, 2 }
  0x40   : > { %v198_v13 = vrot.slane %v197_v11, 1  ;;  %v206_v14 = vadd.f32 %v205_v12, %v204_v10 }
  0x42   : > { %v199_v15 = vadd.f32 %v198_v13, %v197_v11  ;;  %v207_v16 = vrot.slane %v206_v14, 1 }
  0x44   : > { %v210_v17 = vsel %vm209_vm0, %v199_v15, 0.0  ;;  %v208_v18 = vadd.f32 %v207_v16, %v206_v14 }
  0x45   : > { %211 = vadd.xlane.f32.xlu0 %v210_v17 }
  0x46   : > { %v223_v19 = vsel %vm209_vm0, %v208_v18, 0.0 }
  0x49   : > { %224 = vadd.xlane.f32.xlu0 %v223_v19 }
  0xce   : > { %v212_v20 = vpop.xlane.xlu0 %211 }
  0xcf   : > { %v213_v21 = vrot.slane %v212_v20, 4 }
  0xd1   : > { %v214_v22 = vadd.f32 %v213_v21, %v212_v20 }
  0xd2   : > { %v225_v23 = vpop.xlane.xlu0 %224 }
  0xd3   : > { %v215_v24 = vrot.slane %v214_v22, 2  ;;  %v226_v25 = vrot.slane %v225_v23, 4 }
  0xd5   : > { %v227_v26 = vadd.f32 %v226_v25, %v225_v23  ;;  %v216_v27 = vadd.f32 %v215_v24, %v214_v22 }
  0xd7   : > { %v228_v28 = vrot.slane %v227_v26, 2  ;;  %v217_v29 = vrot.slane %v216_v27, 1 }
  0xd9   : > { %v229_v30 = vadd.f32 %v228_v28, %v227_v26  ;;  %v218_v31 = vadd.f32 %v217_v29, %v216_v27 }
  0xdb   : > { %370 = vpush %v218_v31  ;;  %v230_v32 = vrot.slane %v229_v30, 1 }
  0xdd   : > { %v231_v33 = vadd.f32 %v230_v32, %v229_v30 }
  0xdf   : > { %372 = vpush %v231_v33 }
 0x10c   : > { %s371_s23 = spop %370 }
 0x10d   : > { %s222_s4 = smul.f32 0.00048828125, %s371_s23 }
 0x10f   : > { %s236_s6 = smul.f32 %s222_s4, %s222_s4  ;;  %v243_v40 = vstv %s222_s4  ;;  %s669_s4 = scalar_lea.hbm %s717_s3, %s369_s29 }
 0x110   : > { %s373_s7 = spop %372  ;;  %v244_v43 = vsub.f32 %v189_v0, %v243_v40  ;;  %v245_v44 = vsub.f32 %v190_v1, %v243_v40 }
 0x111   : > { %s235_s8 = smul.f32 0.00048828125, %s373_s7 }
 0x113   : > { %s237_s17 = ssub.f32 %s235_s8, %s236_s6  ;;  %s527_s8 = smov [#allocation5]  }
 0x115   : > { %s238_s20 = smax.f32 %s526_s19, %s237_s17  ;;  %s461_s17 = sshll.u32 %s527_s8, 4  ;;  %s462_s17 = int_to_ptr.vmem [resolvable:$false] %s461_s17 }
 0x116   : > { %s239_s22 = sadd.f32 1e-05, %s238_s20  ;;  %s463_s19 = scalar_lea.vmem %s462_s17, 512 }
 0x117   : > { %p464_p5 = scmp.lt.s32.totalorder %s671_s10, %s462_s17  ;;  %p465_p7 = scmp.lt.s32.totalorder %s463_s19, %s457_s9 }
 0x118   : > { %v240_v34 = vstv %s239_s22 }
 0x119   : > { %427 = vrsqrt.f32 %v240_v34  ;;  %p466_p8 = por %p465_p7, %p464_p5 }
 0x11b   : > { %p467_p10 = pnand %p466_p8, %p460_p4 }
 0x126   : > { %v428_v35 = vpop.eup %427 }
 0x127   : > { %374 = vpush %v428_v35 }
 0x158   : > { %s375_s28 = spop %374 }
 0x159   : > { %v246_v41 = vstv %s375_s28 }
 0x15a   : > { %v247_v42 = vmul.f32 %v246_v41, %v191_v38 }
 0x15c   : > { %v252_v45 = vrot.slane %v247_v42, %v251_v39 }
 0x15e   : > { %v254_v47 = vmul.f32 %v252_v45, %v244_v43  ;;  %v255_v48 = vmul.f32 %v252_v45, %v245_v44 }
 0x160   : > { %v262_v49 = vadd.f32 %v362_v46, %v254_v47  ;;  %v263_v50 = vadd.f32 %v362_v46, %v255_v48 }
 0x162   : > { %264 = vst [vmem:[%s188_s30] sm:$0xff] %v262_v49  ;;  %265 = vst [vmem:[%s188_s30 + $0x8] sm:$0xff] %v263_v50 }
 0x163   : > { %470 = shalt.err (!%p467_p10)
}
 0x164   : > { %s471_s20 = scalar_lea.hbm %s669_s4, 256  ;;  %s475_s27 = scalar_lea.hbm %s717_s3, 512 }
 0x165   : > { %p472_p0 = scmp.ne.s32.totalorder %s669_s4, %s471_s20  ;;  %p476_p1 = scmp.lt.s32.totalorder %s669_s4, %s717_s3 }
 0x166   : > { %p477_p3 = scmp.lt.s32.totalorder %s475_s27, %s471_s20 }
 0x167   : > { %p473_p2 = pnand %p472_p0, %p726_p12 }
 0x168   : > { %p478_p6 = por %p477_p3, %p476_p1 }
 0x169   : > { %p474_p9 = pneg %p473_p2 }
 0x16b   : > { %p479_p11 = pnand %p478_p6, %p474_p9 }
 0x16d   : > { %482 = shalt.err (!%p479_p11)
}
 0x16e   : > { %s528_s30 = smov 128   ;;  %s529_s11 = smov 8  }
 0x16f   : > { %378 = dma.vmem_to_hbm [thread:$0]  (%p726_p12), %s671_s10, 256, %s669_s4, %s267_s16, %s528_s30, %s528_s30, %s529_s11  }
 0x170 PF: > { %s295_s23 = sand.u32 1, %s509_s12   ;;  %p727_p13 = scmp.ne.s32.totalorder %s723_s25, 0 }
 0x171   : > { %p728_p4 = scmp.ge.s32.totalorder %s521_s15, 2  ;;  %s296_s6 = scalar_lea.sflag [#allocation4], %s295_s23 }
 0x173   : > { %p385_p5 = pnand %p728_p4, %p727_p13 }
 0x175   : > { %p386_p7 = pneg %p385_p5 }
 0x177   : > { %504 = dma.done.wait (%p386_p7), %s296_s6, 256  }
 0x178   : > { %506 = vsyncadd (%p386_p7), %s296_s6, 4294967040  ;;  %p16_p8 = scmp.ge.s32.totalorder %s575_s18, 4   ;;  %s729_s12 = smov %s513_s13 }
 0x179   : > { %s730_s13 = smov %s517_s14  ;;  %s731_s14 = smov %s587_s21 }
 0x17a   : > { %s732_s15 = smov %s575_s18  ;;  %18 = sbr.rel (!%p16_p8) target bundleno = 5 (0x5), region = 77 }
 0x17f   :  { %301 = vsyncpa [#allocation3], 1 }
 0x180   :  { %303 = vsyncpa [#allocation3 + $0x1], 1 }
 0x181   :  { %304 = vsyncpa [#allocation4], 1 }
 0x182   :  { %306 = vsyncpa [#allocation4 + $0x1], 1 }

</bundles_post_ra>
